<compile_context>
chip_gen: v7x
topology: tpu7x:2x2x1
jax: 0.10.0
libtpu: 0.0.40
codegen_flags: <defaults>
</compile_context>

<pallas_src>
import functools

import jax
import jax.numpy as jnp
import numpy as np
from jax import lax
from jax.experimental import pallas as pl
from jax.experimental.pallas import tpu as pltpu


# ----------------------------- fused kernel ---------------------------------


def _gtmha_fused_kernel(a_tiled_ref, neg_ref, h_ref, wqkv_ref, bqkv_ref,
                        rep_ref, mask3_ref, comp3_ref, expand_ref, rept_ref,
                        wo_ref, bo_ref, o_ref, *, head_dim):
    f32 = jnp.float32
    N, D = h_ref.shape
    hd = head_dim

    # ---- 1) fused Q/K/V projection: one [N, D] @ [D, 3D] MXU matmul --------
    # (1/sqrt(head_dim) is already folded into the Q slice of wqkv/bqkv)
    qkv = jnp.dot(h_ref[...], wqkv_ref[...],
                  preferred_element_type=f32) + bqkv_ref[...]          # [N, 3D]

    # ---- 2) torch raw row-major reshape [N, 3D] -> q/k/v_flat [H*N, hd] ----
    # Realized on the idle MXU with constant 0/1 operands instead of 192 tiny
    # masked copies:  replicate rows (rep), keep lane chunk r%H (mask3),
    # compress the kept chunk to lanes [0, hd) per section (comp3).
    # Exact in f32: each result element is one 1.0*x plus exact zeros.
    mask3 = mask3_ref[...]                                             # [HN, 3D]
    qkv_rep = jnp.dot(rep_ref[...], qkv, preferred_element_type=f32)   # [HN, 3D]
    qkv_flat = jnp.dot(qkv_rep * mask3, comp3_ref[...],
                       preferred_element_type=f32)                     # [HN, 3hd]
    q_f = qkv_flat[:, 0:hd]                                            # [HN, hd]
    k_f = qkv_flat[:, hd:2 * hd]
    v_f = qkv_flat[:, 2 * hd:3 * hd]

    # ---- 3) attention, ALL heads fused into two stacked matmuls ------------
    # Scores are block-diagonal over consecutive N-row blocks (one block per
    # head); off-block entries are pushed to -1e30 BEFORE the softmax so the
    # single row-softmax over H*N columns equals the per-head softmax exactly.
    s = lax.dot_general(q_f, k_f, (((1,), (1,)), ((), ())),
                        preferred_element_type=f32)                    # [HN, HN]
    s = s * a_tiled_ref[...] + neg_ref[...]

    m = jnp.max(s, axis=-1, keepdims=True)
    e = jnp.exp(s - m)
    inv = pl.reciprocal(jnp.sum(e, axis=-1, keepdims=True), approx=False)
    p = e * inv

    o_flat = jnp.dot(p, v_f, preferred_element_type=f32)               # [HN, hd]

    # ---- 4) torch raw row-major merge [H*N, hd] -> [N, D], again via MXU ---
    # expand lanes hd -> D (repeat), keep chunk r%H, sum rows back per token.
    o_exp = jnp.dot(o_flat, expand_ref[...], preferred_element_type=f32)   # [HN, D]
    o_sel = o_exp * mask3[:, 0:D]
    out2d = jnp.dot(rept_ref[...], o_sel, preferred_element_type=f32)      # [N, D]

    # ---- 5) output projection, single [N, D] store --------------------------
    o_ref[...] = jnp.dot(out2d, wo_ref[...],
                         preferred_element_type=f32) + bo_ref[...]


# -------------------- constant reshuffle operands (host-side) ----------------


@functools.lru_cache(maxsize=None)
def _reshuffle_constants(N, D, H):
    """Constant 0/1 matrices realizing torch's raw reshape on the MXU."""
    hd = D // H
    HN = H * N
    r = np.arange(HN)

    # rep[r, i]  = 1  iff  i == r // H            (row replication)
    rep = (np.arange(N)[None, :] == (r // H)[:, None]).astype(np.float32)
    rept = np.ascontiguousarray(rep.T)            # [N, HN] (row merge / sum)

    # mask3[r, j] = 1 iff (j % D) // hd == r % H  (keep lane chunk r%H per section)
    j3 = np.arange(3 * D)
    mask3 = (((j3 % D) // hd)[None, :] == (r % H)[:, None]).astype(np.float32)

    # comp3[j, d] = 1 iff same q/k/v section and (j % D) % hd == d % hd
    d3 = np.arange(3 * hd)
    comp3 = (((j3 // D)[:, None] == (d3 // hd)[None, :]) &
             (((j3 % D) % hd)[:, None] == (d3 % hd)[None, :])).astype(np.float32)

    # expand[d, j] = 1 iff j % hd == d            (hd -> D lane expansion)
    expand = (np.arange(D)[None, :] % hd == np.arange(hd)[:, None]).astype(np.float32)

    # neg[r, r'] = 0 in-block (same head), -1e30 off-block (pre-softmax mask)
    blk = r // N
    neg = np.where(blk[:, None] == blk[None, :], 0.0, -1e30).astype(np.float32)

    return rep, rept, mask3, comp3, expand, neg


# ----------------------------- wrapper ---------------------------------------


def gtmha_forward(A, h, params, num_heads):
    N, D = h.shape
    assert D % num_heads == 0
    hd = D // num_heads
    HN = num_heads * N
    scaling = float(hd) ** (-0.5)
    wq, bq, wk, bk, wv, bv, wo, bo = params   # PyTorch layout: W [out, in], b [out]

    # Weight glue (free): pre-transpose to [in, out], concatenate Q/K/V, fold
    # the 1/sqrt(head_dim) scaling into the Q slice.
    wqkv_t = jnp.concatenate([wq.T * scaling, wk.T, wv.T], axis=1)     # [D, 3D]
    bqkv = jnp.concatenate([bq * scaling, bk, bv]).reshape(1, 3 * D)   # [1, 3D]
    wo_t = wo.T                                                        # [D, D]
    bo2 = bo.reshape(1, D)

    # Constant reshuffle operands + per-call tiled A (review: free glue).
    rep, rept, mask3, comp3, expand, neg = _reshuffle_constants(N, D, num_heads)
    a_tiled = jnp.tile(A, (num_heads, num_heads))                      # [HN, HN]

    # Advisory cost so XLA schedules around the fused custom call.
    D3, hd3 = 3 * D, 3 * hd
    flops = 2 * (N * D * D3 + HN * N * D3 + HN * D3 * hd3
                 + 2 * HN * HN * hd + HN * hd * D + N * HN * D + N * D * D)
    transcendentals = HN * HN
    bytes_accessed = 4 * (2 * HN * HN + 2 * N * D + D * D3 + D3 + HN * N
                          + HN * D3 + D3 * hd3 + hd * D + N * HN + D * D + D)

    vmem = pl.BlockSpec(memory_space=pltpu.MemorySpace.VMEM)
    f32 = jnp.float32

    return pl.pallas_call(
        functools.partial(_gtmha_fused_kernel, head_dim=hd),
        out_shape=jax.ShapeDtypeStruct((N, D), f32),
        in_specs=[vmem] * 12,
        out_specs=vmem,
        cost_estimate=pl.CostEstimate(flops=flops,
                                      transcendentals=transcendentals,
                                      bytes_accessed=bytes_accessed),
    )(a_tiled, jnp.asarray(neg), h, wqkv_t, bqkv,
      jnp.asarray(rep), jnp.asarray(mask3), jnp.asarray(comp3),
      jnp.asarray(expand), jnp.asarray(rept), wo_t, bo2)


# ----------------------------- reference ------------------------------------


def gtmha_ref(A, h, params, num_heads):
    N, D = h.shape
    hd = D // num_heads
    scaling = float(hd) ** (-0.5)
    wq, bq, wk, bk, wv, bv, wo, bo = params
    q = (h @ wq.T + bq).reshape(num_heads, N, hd) * scaling
    k = (h @ wk.T + bk).reshape(num_heads, N, hd)
    v = (h @ wv.T + bv).reshape(num_heads, N, hd)
    t = jnp.einsum("hnd,hmd->hnm", q, k)
    attn = jax.nn.softmax(t * A, axis=2)
    out = jnp.einsum("hnm,hmd->hnd", attn, v)
    return out.reshape(N, D) @ wo.T + bo


# ----------------------------- main ------------------------------------------


if __name__ == "__main__":
    # Small shapes consistent with the module: hidden=32, heads=8 -> head_dim=4,
    # N=16 graph nodes (N != num_heads to exercise the general index math).
    N, hidden, num_heads = 16, 32, 8

    key = jax.random.PRNGKey(0)
    keys = jax.random.split(key, 10)

    h = jax.random.normal(keys[0], (N, hidden), dtype=jnp.float32)
    A = jax.random.uniform(keys[1], (N, N), dtype=jnp.float32)  # graph weight matrix

    def lin(kw, kb):
        w = 0.1 * jax.random.normal(kw, (hidden, hidden), dtype=jnp.float32)  # [out, in]
        b = 0.1 * jax.random.normal(kb, (hidden,), dtype=jnp.float32)
        return w, b

    wq, bq = lin(keys[2], keys[3])
    wk, bk = lin(keys[4], keys[5])
    wv, bv = lin(keys[6], keys[7])
    wo, bo = lin(keys[8], keys[9])
    params = (wq, bq, wk, bk, wv, bv, wo, bo)

    out = gtmha_forward(A, h, params, num_heads)
    out = jax.block_until_ready(out)

    ref = gtmha_ref(A, h, params, num_heads)
    np.testing.assert_allclose(np.asarray(out), np.asarray(ref), rtol=1e-4, atol=1e-4)

    print("KERNEL_OK")
</pallas_src>

<mosaic_0001>
module attributes {stable_mosaic.version = 11 : i64} {
  func.func @_gtmha_fused_kernel(%arg0: memref<128x128xf32, #tpu.memory_space<vmem>>, %arg1: memref<128x128xf32, #tpu.memory_space<vmem>>, %arg2: memref<16x32xf32, #tpu.memory_space<vmem>>, %arg3: memref<32x96xf32, #tpu.memory_space<vmem>>, %arg4: memref<1x96xf32, #tpu.memory_space<vmem>>, %arg5: memref<128x16xf32, #tpu.memory_space<vmem>>, %arg6: memref<128x96xf32, #tpu.memory_space<vmem>>, %arg7: memref<96x12xf32, #tpu.memory_space<vmem>>, %arg8: memref<4x32xf32, #tpu.memory_space<vmem>>, %arg9: memref<16x128xf32, #tpu.memory_space<vmem>>, %arg10: memref<32x32xf32, #tpu.memory_space<vmem>>, %arg11: memref<1x32xf32, #tpu.memory_space<vmem>>, %arg12: memref<16x32xf32, #tpu.memory_space<vmem>>) attributes {dimension_semantics = [], scalar_prefetch = 0 : i64, scratch_operands = 0 : i64, tpu.core_type = #tpu.core_type<tc>} {
    %c0 = arith.constant 0 : index
    %c0_0 = arith.constant 0 : index
    %0 = vector.load %arg2[%c0, %c0_0] : memref<16x32xf32, #tpu.memory_space<vmem>>, vector<16x32xf32>
    %c0_1 = arith.constant 0 : index
    %c0_2 = arith.constant 0 : index
    %1 = vector.load %arg3[%c0_1, %c0_2] : memref<32x96xf32, #tpu.memory_space<vmem>>, vector<32x96xf32>
    %cst = arith.constant dense<0.000000e+00> : vector<16x96xf32>
    %2 = tpu.matmul %0, %1, %cst {dimension_numbers = #tpu.dot_dimension_numbers<[1], [0], [0], [1], [0, 0, 1, 1], [], []>} : vector<16x32xf32>, vector<32x96xf32>, vector<16x96xf32> -> vector<16x96xf32>
    %c0_3 = arith.constant 0 : index
    %c0_4 = arith.constant 0 : index
    %3 = vector.load %arg4[%c0_3, %c0_4] : memref<1x96xf32, #tpu.memory_space<vmem>>, vector<1x96xf32>
    %4 = vector.broadcast %3 : vector<1x96xf32> to vector<16x96xf32>
    %5 = arith.addf %2, %4 : vector<16x96xf32>
    %c0_5 = arith.constant 0 : index
    %c0_6 = arith.constant 0 : index
    %6 = vector.load %arg6[%c0_5, %c0_6] : memref<128x96xf32, #tpu.memory_space<vmem>>, vector<128x96xf32>
    %c0_7 = arith.constant 0 : index
    %c0_8 = arith.constant 0 : index
    %7 = vector.load %arg5[%c0_7, %c0_8] : memref<128x16xf32, #tpu.memory_space<vmem>>, vector<128x16xf32>
    %cst_9 = arith.constant dense<0.000000e+00> : vector<128x96xf32>
    %8 = tpu.matmul %7, %5, %cst_9 {dimension_numbers = #tpu.dot_dimension_numbers<[1], [0], [0], [1], [0, 0, 1, 1], [], []>} : vector<128x16xf32>, vector<16x96xf32>, vector<128x96xf32> -> vector<128x96xf32>
    %9 = arith.mulf %8, %6 : vector<128x96xf32>
    %c0_10 = arith.constant 0 : index
    %c0_11 = arith.constant 0 : index
    %10 = vector.load %arg7[%c0_10, %c0_11] : memref<96x12xf32, #tpu.memory_space<vmem>>, vector<96x12xf32>
    %cst_12 = arith.constant dense<0.000000e+00> : vector<128x12xf32>
    %11 = tpu.matmul %9, %10, %cst_12 {dimension_numbers = #tpu.dot_dimension_numbers<[1], [0], [0], [1], [0, 0, 1, 1], [], []>} : vector<128x96xf32>, vector<96x12xf32>, vector<128x12xf32> -> vector<128x12xf32>
    %12 = vector.extract_strided_slice %11 {offsets = [0, 0], sizes = [128, 4], strides = [1, 1]} : vector<128x12xf32> to vector<128x4xf32>
    %13 = vector.extract_strided_slice %11 {offsets = [0, 4], sizes = [128, 4], strides = [1, 1]} : vector<128x12xf32> to vector<128x4xf32>
    %14 = vector.extract_strided_slice %11 {offsets = [0, 8], sizes = [128, 4], strides = [1, 1]} : vector<128x12xf32> to vector<128x4xf32>
    %cst_13 = arith.constant dense<0.000000e+00> : vector<128x128xf32>
    %15 = tpu.matmul %12, %13, %cst_13 {dimension_numbers = #tpu.dot_dimension_numbers<[1], [1], [0], [0], [0, 0, 1, 0], [], []>} : vector<128x4xf32>, vector<128x4xf32>, vector<128x128xf32> -> vector<128x128xf32>
    %c0_14 = arith.constant 0 : index
    %c0_15 = arith.constant 0 : index
    %16 = vector.load %arg0[%c0_14, %c0_15] : memref<128x128xf32, #tpu.memory_space<vmem>>, vector<128x128xf32>
    %17 = arith.mulf %15, %16 : vector<128x128xf32>
    %c0_16 = arith.constant 0 : index
    %c0_17 = arith.constant 0 : index
    %18 = vector.load %arg1[%c0_16, %c0_17] : memref<128x128xf32, #tpu.memory_space<vmem>>, vector<128x128xf32>
    %19 = arith.addf %17, %18 : vector<128x128xf32>
    %cst_18 = arith.constant dense<0xFF800000> : vector<128xf32>
    %20 = vector.multi_reduction <maximumf>, %19, %cst_18 [1] : vector<128x128xf32> to vector<128xf32>
    %21 = vector.shape_cast %20 : vector<128xf32> to vector<128x1xf32>
    %22 = vector.broadcast %21 : vector<128x1xf32> to vector<128x128xf32>
    %23 = arith.subf %19, %22 : vector<128x128xf32>
    %24 = math.exp %23 : vector<128x128xf32>
    %cst_19 = arith.constant dense<0.000000e+00> : vector<128xf32>
    %25 = vector.multi_reduction <add>, %24, %cst_19 [1] : vector<128x128xf32> to vector<128xf32>
    %26 = vector.shape_cast %25 : vector<128xf32> to vector<128x1xf32>
    %27 = tpu.reciprocal %26 : vector<128x1xf32> -> vector<128x1xf32>
    %28 = vector.broadcast %27 : vector<128x1xf32> to vector<128x128xf32>
    %29 = arith.mulf %24, %28 : vector<128x128xf32>
    %cst_20 = arith.constant dense<0.000000e+00> : vector<128x4xf32>
    %30 = tpu.matmul %29, %14, %cst_20 {dimension_numbers = #tpu.dot_dimension_numbers<[1], [0], [0], [1], [0, 0, 1, 1], [], []>} : vector<128x128xf32>, vector<128x4xf32>, vector<128x4xf32> -> vector<128x4xf32>
    %c0_21 = arith.constant 0 : index
    %c0_22 = arith.constant 0 : index
    %31 = vector.load %arg8[%c0_21, %c0_22] : memref<4x32xf32, #tpu.memory_space<vmem>>, vector<4x32xf32>
    %cst_23 = arith.constant dense<0.000000e+00> : vector<128x32xf32>
    %32 = tpu.matmul %30, %31, %cst_23 {dimension_numbers = #tpu.dot_dimension_numbers<[1], [0], [0], [1], [0, 0, 1, 1], [], []>} : vector<128x4xf32>, vector<4x32xf32>, vector<128x32xf32> -> vector<128x32xf32>
    %33 = vector.extract_strided_slice %6 {offsets = [0, 0], sizes = [128, 32], strides = [1, 1]} : vector<128x96xf32> to vector<128x32xf32>
    %34 = arith.mulf %32, %33 : vector<128x32xf32>
    %c0_24 = arith.constant 0 : index
    %c0_25 = arith.constant 0 : index
    %35 = vector.load %arg9[%c0_24, %c0_25] : memref<16x128xf32, #tpu.memory_space<vmem>>, vector<16x128xf32>
    %cst_26 = arith.constant dense<0.000000e+00> : vector<16x32xf32>
    %36 = tpu.matmul %35, %34, %cst_26 {dimension_numbers = #tpu.dot_dimension_numbers<[1], [0], [0], [1], [0, 0, 1, 1], [], []>} : vector<16x128xf32>, vector<128x32xf32>, vector<16x32xf32> -> vector<16x32xf32>
    %c0_27 = arith.constant 0 : index
    %c0_28 = arith.constant 0 : index
    %37 = vector.load %arg10[%c0_27, %c0_28] : memref<32x32xf32, #tpu.memory_space<vmem>>, vector<32x32xf32>
    %cst_29 = arith.constant dense<0.000000e+00> : vector<16x32xf32>
    %38 = tpu.matmul %36, %37, %cst_29 {dimension_numbers = #tpu.dot_dimension_numbers<[1], [0], [0], [1], [0, 0, 1, 1], [], []>} : vector<16x32xf32>, vector<32x32xf32>, vector<16x32xf32> -> vector<16x32xf32>
    %c0_30 = arith.constant 0 : index
    %c0_31 = arith.constant 0 : index
    %39 = vector.load %arg11[%c0_30, %c0_31] : memref<1x32xf32, #tpu.memory_space<vmem>>, vector<1x32xf32>
    %40 = vector.broadcast %39 : vector<1x32xf32> to vector<16x32xf32>
    %41 = arith.addf %38, %40 : vector<16x32xf32>
    %c0_32 = arith.constant 0 : index
    %c0_33 = arith.constant 0 : index
    %42 = vector.load %arg12[%c0_32, %c0_33] : memref<16x32xf32, #tpu.memory_space<vmem>>, vector<16x32xf32>
    tpu.vector_store %arg12[%c0_32, %c0_33], %41 {strides = array<i32>} : memref<16x32xf32, #tpu.memory_space<vmem>>, vector<16x32xf32>,
    return
  }
}

</mosaic_0001>

<bundles_post_ra>
// kernel: tpu_custom_call.1
= control target key start
LH: loop header
LB: loop body
LE: loop exit
PB: predicated region body
PF: predicated region fallthrough
CT: control target
= control target key end

     0   :  { %vm55_vm0 = vcmask 261120   ;;  %s3232_s0 = inlined_call_operand.vmem [shape: f32[128,128], index: 0, kind: input, shape index: {}]   ;;  %s3233_s1 = inlined_call_operand.vmem [shape: f32[128,128], index: 1, kind: input, shape index: {}]   ;;  %s3234_s2 = inlined_call_operand.vmem [shape: f32[16,32], index: 2, kind: input, shape index: {}]   ;;  %s3235_s3 = inlined_call_operand.vmem [shape: f32[32,96], index: 3, kind: input, shape index: {}]   ;;  %s3236_s4 = inlined_call_operand.vmem [shape: f32[1,96], index: 4, kind: input, shape index: {}]   ;;  %s3237_s5 = inlined_call_operand.vmem [shape: f32[128,16], index: 5, kind: input, shape index: {}]   ;;  %s3238_s6 = inlined_call_operand.vmem [shape: f32[128,96], index: 6, kind: input, shape index: {}]   ;;  %s3239_s7 = inlined_call_operand.vmem [shape: f32[96,12], index: 7, kind: input, shape index: {}]   ;;  %s3240_s8 = inlined_call_operand.vmem [shape: f32[4,32], index: 8, kind: input, shape index: {}]   ;;  %s3241_s9 = inlined_call_operand.vmem [shape: f32[16,128], index: 9, kind: input, shape index: {}]   ;;  %s3242_s10 = inlined_call_operand.vmem [shape: f32[32,32], index: 10, kind: input, shape index: {}]   ;;  %s3243_s11 = inlined_call_operand.vmem [shape: f32[1,32], index: 11, kind: input, shape index: {}]   ;;  %s3244_s12 = inlined_call_operand.hbm [shape: f32[16,32], index: 12, kind: output, shape index: {}]  }
   0x1   :  { %v44_v0 = vld [vmem:[%s3235_s3] sm:$0xff]  ;;  %v45_v1 = vld [vmem:[%s3235_s3 + $0x8] sm:$0xff]  ;;  %v46_v2 = vld [vmem:[%s3235_s3 + $0x10] sm:$0xff] }
   0x2   :  { %v2160_v3 = vpack.c.bf16 %v45_v1, %v44_v0  ;;  %v47_v4 = vld [vmem:[%s3235_s3 + $0x18] sm:$0xff]  ;;  %v42_v5 = vld [vmem:[%s3234_s2] sm:$0xff] }
   0x3   :  { %v2164_v6 = vpack.c.bf16 %v47_v4, %v46_v2  ;;  %1897 = vmatprep.mubr.msk.f32.mxu1 %vm55_vm0, %v42_v5 }
   0x4   :  { %17 = vsyncpa [#allocation3], 0  ;;  %2161 = vmatprep.subr.bf16.mxu1 %v2160_v3  ;;  %v43_v7 = vld [vmem:[%s3234_s2 + $0x8] sm:$0xff]  ;;  %v153_v8 = vld [vmem:[%s3237_s5] sm:$0xff]  ;;  %vm169_vm1 = vcmask 130048   ;;  %vm391_vm2 = vcmask 785408  }
   0x5   :  { %2163 = vmatpush3.bf16.msra.mxu1 %v2160_v3  ;;  %v379_v9 = vld [vmem:[%s3239_s7] sm:$0xff]  ;;  %v380_v10 = vld [vmem:[%s3239_s7 + $0x8] sm:$0xff]  ;;  %v381_v11 = vld [vmem:[%s3239_s7 + $0x10] sm:$0xff]  ;;  %vm633_vm3 = vcmask 31744   ;;  %s2505_s17 = smov 124   ;;  %s2506_s18 = smov 120  }
   0x6   :  { %2165 = vmatprep.subr.bf16.mxu1 %v2164_v6  ;;  %v2172_v12 = vpack.c.bf16 %v380_v10, %v379_v9  ;;  %v382_v13 = vld [vmem:[%s3239_s7 + $0x18] sm:$0xff]  ;;  %v383_v15 = vld [vmem:[%s3239_s7 + $0x20] sm:$0xff]  ;;  %v384_v16 = vld [vmem:[%s3239_s7 + $0x28] sm:$0xff]  ;;  %vm1293_vm5 = vcmask 1043456   ;;  %s2507_s13 = smov [#allocation2]  }
   0x7   :  { %v2176_v14 = vpack.c.bf16 %v382_v13, %v381_v11  ;;  %v2180_v17 = vpack.c.bf16 %v384_v16, %v383_v15  ;;  %v385_v18 = vld [vmem:[%s3239_s7 + $0x30] sm:$0xff]  ;;  %v386_v19 = vld [vmem:[%s3239_s7 + $0x38] sm:$0xff]  ;;  %v387_v21 = vld [vmem:[%s3239_s7 + $0x40] sm:$0xff]  ;;  %s1634_s14 = sshll.u32 %s2507_s13, 4  ;;  %s1635_s14 = int_to_ptr.vmem [resolvable:$true] %s1634_s14 }
   0x8   :  { %2173 = vmatprep.subr.bf16.mxu0 %v2172_v12  ;;  %v2184_v20 = vpack.c.bf16 %v386_v19, %v385_v18  ;;  %v388_v22 = vld [vmem:[%s3239_s7 + $0x48] sm:$0xff]  ;;  %v1645_v24 = vld [vmem:[%s3236_s4] ss:$0 sm:$0xff]  ;;  %v155_v31 = vld [vmem:[%s3237_s5 + $0x10] sm:$0xff]  ;;  %p2486_p1 = scmp.lt.s32.totalorder %s1635_s14, %s1635_s14 }
   0x9   :  { %2167 = vmatpush3.bf16.msra.mxu1 %v2164_v6  ;;  %2175 = vmatpush3.bf16.msra.mxu0 %v2172_v12  ;;  %v2188_v23 = vpack.c.bf16 %v388_v22, %v387_v21  ;;  %v154_v30 = vld [vmem:[%s3237_s5 + $0x8] sm:$0xff]  ;;  %v156_v32 = vld [vmem:[%s3237_s5 + $0x18] sm:$0xff]  ;;  %v157_v33 = vld [vmem:[%s3237_s5 + $0x20] sm:$0xff] }
   0xa   :  { %2177 = vmatprep.subr.bf16.mxu0 %v2176_v14  ;;  %v158_v34 = vld [vmem:[%s3237_s5 + $0x28] sm:$0xff]  ;;  %v159_v35 = vld [vmem:[%s3237_s5 + $0x30] sm:$0xff]  ;;  %v160_v36 = vld [vmem:[%s3237_s5 + $0x38] sm:$0xff] }
   0xb   :  { %v161_v37 = vld [vmem:[%s3237_s5 + $0x40] sm:$0xff]  ;;  %v162_v38 = vld [vmem:[%s3237_s5 + $0x48] sm:$0xff]  ;;  %v163_v39 = vld [vmem:[%s3237_s5 + $0x50] sm:$0xff] }
   0xc   :  { %1898 = vmatmul.mubr.msk.f32.vlgmr.msra.gmra.mrb[0].mxu1 %vm55_vm0, %v43_v7  ;;  %v164_v40 = vld [vmem:[%s3237_s5 + $0x58] sm:$0xff]  ;;  %v165_v41 = vld [vmem:[%s3237_s5 + $0x60] sm:$0xff]  ;;  %v166_v42 = vld [vmem:[%s3237_s5 + $0x68] sm:$0xff] }
   0xd   :  { %1904 = vmatprep.mubr.msk.f32.mxu1 %vm169_vm1, %v153_v8  ;;  %2179 = vmatpush3.bf16.msra.mxu0 %v2176_v14  ;;  %v167_v43 = vld [vmem:[%s3237_s5 + $0x70] sm:$0xff]  ;;  %v168_v44 = vld [vmem:[%s3237_s5 + $0x78] sm:$0xff]  ;;  %v137_v48 = vld [vmem:[%s3238_s6] sm:$0xff] }
   0xe   :  { %2181 = vmatprep.subr.bf16.mxu0 %v2180_v17  ;;  %v389_v45 = vld [vmem:[%s3239_s7 + $0x50] sm:$0xff]  ;;  %v390_v46 = vld [vmem:[%s3239_s7 + $0x58] sm:$0xff]  ;;  %v138_v49 = vld [vmem:[%s3238_s6 + $0x8] sm:$0xff] }
   0xf   :  { %v2192_v47 = vpack.c.bf16 %v390_v46, %v389_v45  ;;  %v140_v53 = vld [vmem:[%s3238_s6 + $0x18] sm:$0xff]  ;;  %v139_v55 = vld [vmem:[%s3238_s6 + $0x10] sm:$0xff]  ;;  %v142_v60 = vld [vmem:[%s3238_s6 + $0x28] sm:$0xff] }
  0x10   :  { %v141_v61 = vld [vmem:[%s3238_s6 + $0x20] sm:$0xff]  ;;  %v144_v2 = vld [vmem:[%s3238_s6 + $0x38] sm:$0xff]  ;;  %v143_v3 = vld [vmem:[%s3238_s6 + $0x30] sm:$0xff] }
  0x11   :  { %2183 = vmatpush3.bf16.msra.mxu0 %v2180_v17  ;;  %v146_v8 = vld [vmem:[%s3238_s6 + $0x48] sm:$0xff]  ;;  %v145_v9 = vld [vmem:[%s3238_s6 + $0x40] sm:$0xff]  ;;  %v148_v14 = vld [vmem:[%s3238_s6 + $0x58] sm:$0xff] }
  0x12   :  { %2185 = vmatprep.subr.bf16.mxu0 %v2184_v20  ;;  %v147_v15 = vld [vmem:[%s3238_s6 + $0x50] sm:$0xff]  ;;  %v149_v21 = vld [vmem:[%s3238_s6 + $0x60] sm:$0xff]  ;;  %vm2832_vm4 = vmpackc.low %vm633_vm3, %vm633_vm3 }
  0x15   :  { %2187 = vmatpush3.bf16.msra.mxu0 %v2184_v20  ;;  %v150_v20 = vld [vmem:[%s3238_s6 + $0x68] sm:$0xff] }
  0x16   :  { %2189 = vmatprep.subr.bf16.mxu0 %v2188_v23 }
  0x19   :  { %2191 = vmatpush3.bf16.msra.mxu0 %v2188_v23 }
  0x1a   :  { %2193 = vmatprep.subr.bf16.mxu0 %v2192_v47 }
  0x1d   :  { %2195 = vmatpush3.bf16.msra.mxu0 %v2192_v47 }
  0xdf   :  { %v1899_v25 = vpop.f32.mrb[0].mxu1 }
  0xe0   :  { %v134_v26 = vadd.f32 %v1899_v25, %v1645_v24  ;;  %v128_v27 = vpop.f32.mrb[1].mxu1 }
  0xe1   :  { %v129_v28 = vadd.f32 %v1645_v24, %v128_v27  ;;  %v151_v27 = vld [vmem:[%s3238_s6 + $0x70] sm:$0xff] }
  0xe3   :  { %v2168_v29 = vpack.c.bf16 %v134_v26, %v129_v28  ;;  %v152_v26 = vld [vmem:[%s3238_s6 + $0x78] sm:$0xff] }
  0xe5   :  { %2169 = vmatprep.subr.bf16.mxu1 %v2168_v29 }
  0xe6   :  { %2171 = vmatpush3.bf16.msra.mxu1 %v2168_v29 }
  0xe9   :  { %1905 = vmatmul.mubr.msk.f32.vlgmr.msra.gmra.mrb[2].mxu1 %vm169_vm1, %v154_v30 }
  0xea   :  { %1907 = vmatprep.mubr.msk.f32.mxu1 %vm169_vm1, %v155_v31 }
  0xed   :  { %1908 = vmatmul.mubr.msk.f32.gmra.mrb[4].mxu1 %vm169_vm1, %v156_v32 }
  0xee   :  { %1910 = vmatprep.mubr.msk.f32.mxu1 %vm169_vm1, %v157_v33 }
  0xf1   :  { %1911 = vmatmul.mubr.msk.f32.gmra.mrb[6].mxu1 %vm169_vm1, %v158_v34 }
  0xf2   :  { %1913 = vmatprep.mubr.msk.f32.mxu1 %vm169_vm1, %v159_v35 }
  0xf5   :  { %1914 = vmatmul.mubr.msk.f32.gmra.mrb[8].mxu1 %vm169_vm1, %v160_v36 }
  0xf6   :  { %1916 = vmatprep.mubr.msk.f32.mxu1 %vm169_vm1, %v161_v37 }
  0xf9   :  { %1917 = vmatmul.mubr.msk.f32.gmra.mrb[10].mxu1 %vm169_vm1, %v162_v38 }
  0xfa   :  { %1919 = vmatprep.mubr.msk.f32.mxu1 %vm169_vm1, %v163_v39 }
  0xfd   :  { %1920 = vmatmul.mubr.msk.f32.gmra.mrb[12].mxu1 %vm169_vm1, %v164_v40 }
  0xfe   :  { %1922 = vmatprep.mubr.msk.f32.mxu1 %vm169_vm1, %v165_v41 }
 0x101   :  { %1923 = vmatmul.mubr.msk.f32.gmra.mrb[14].mxu1 %vm169_vm1, %v166_v42 }
 0x102   :  { %1925 = vmatprep.mubr.msk.f32.mxu1 %vm169_vm1, %v167_v43 }
 0x105   :  { %1926 = vmatmul.mubr.msk.f32.gmra.mrb[16].mxu1 %vm169_vm1, %v168_v44 }
 0x1bc   :  { %v1906_v50 = vpop.f32.mrb[2].mxu1 }
 0x1bd   :  { %v284_v51 = vpop.f32.mrb[3].mxu1  ;;  %v364_v54 = vmul.f32 %v1906_v50, %v138_v49 }
 0x1be   :  { %v363_v52 = vmul.f32 %v284_v51, %v137_v48 }
 0x1c0   :  { %v1909_v56 = vpop.f32.mrb[4].mxu1  ;;  %1952 = vmatprep.mubr.msk.f32.mxu0 %vm391_vm2, %v363_v52 }
 0x1c1   :  { %v366_v57 = vmul.f32 %v1909_v56, %v140_v53  ;;  %v294_v58 = vpop.f32.mrb[5].mxu1  ;;  %1953 = vmatmul.mubr.msk.f32.vlgmr.msra.gmra.mrb[0].mxu0 %vm391_vm2, %v364_v54 }
 0x1c2   :  { %v365_v59 = vmul.f32 %v294_v58, %v139_v55 }
 0x1c4   :  { %v1912_v62 = vpop.f32.mrb[6].mxu1  ;;  %1955 = vmatprep.mubr.msk.f32.mxu0 %vm391_vm2, %v365_v59  ;;  %v845_v59 = vld [vmem:[%s3232_s0 + $0x10] sm:$0xff] }
 0x1c5   :  { %v368_v63 = vmul.f32 %v1912_v62, %v142_v60  ;;  %v304_v0 = vpop.f32.mrb[7].mxu1  ;;  %1956 = vmatmul.mubr.msk.f32.gmra.mrb[2].mxu0 %vm391_vm2, %v366_v57 }
 0x1c6   :  { %v367_v1 = vmul.f32 %v304_v0, %v141_v61 }
 0x1c8   :  { %v1915_v4 = vpop.f32.mrb[8].mxu1  ;;  %1958 = vmatprep.mubr.msk.f32.mxu0 %vm391_vm2, %v367_v1 }
 0x1c9   :  { %v370_v5 = vmul.f32 %v1915_v4, %v144_v2  ;;  %v314_v6 = vpop.f32.mrb[9].mxu1  ;;  %1959 = vmatmul.mubr.msk.f32.gmra.mrb[4].mxu0 %vm391_vm2, %v368_v63 }
 0x1ca   :  { %v369_v7 = vmul.f32 %v314_v6, %v143_v3 }
 0x1cc   :  { %v1918_v10 = vpop.f32.mrb[10].mxu1  ;;  %1961 = vmatprep.mubr.msk.f32.mxu0 %vm391_vm2, %v369_v7 }
 0x1cd   :  { %v372_v11 = vmul.f32 %v1918_v10, %v146_v8  ;;  %v324_v12 = vpop.f32.mrb[11].mxu1  ;;  %1962 = vmatmul.mubr.msk.f32.gmra.mrb[6].mxu0 %vm391_vm2, %v370_v5 }
 0x1ce   :  { %v371_v13 = vmul.f32 %v324_v12, %v145_v9 }
 0x1d0   :  { %v1921_v16 = vpop.f32.mrb[12].mxu1  ;;  %1964 = vmatprep.mubr.msk.f32.mxu0 %vm391_vm2, %v371_v13 }
 0x1d1   :  { %v374_v17 = vmul.f32 %v1921_v16, %v148_v14  ;;  %v334_v18 = vpop.f32.mrb[13].mxu1  ;;  %1965 = vmatmul.mubr.msk.f32.gmra.mrb[8].mxu0 %vm391_vm2, %v372_v11 }
 0x1d2   :  { %v373_v19 = vmul.f32 %v334_v18, %v147_v15 }
 0x1d4   :  { %v1924_v22 = vpop.f32.mrb[14].mxu1  ;;  %1967 = vmatprep.mubr.msk.f32.mxu0 %vm391_vm2, %v373_v19 }
 0x1d5   :  { %v376_v23 = vmul.f32 %v1924_v22, %v150_v20  ;;  %v344_v24 = vpop.f32.mrb[15].mxu1  ;;  %1968 = vmatmul.mubr.msk.f32.gmra.mrb[10].mxu0 %vm391_vm2, %v374_v17 }
 0x1d6   :  { %v375_v25 = vmul.f32 %v344_v24, %v149_v21 }
 0x1d8   :  { %v1927_v28 = vpop.f32.mrb[16].mxu1  ;;  %1970 = vmatprep.mubr.msk.f32.mxu0 %vm391_vm2, %v375_v25 }
 0x1d9   :  { %v378_v29 = vmul.f32 %v1927_v28, %v152_v26  ;;  %v354_v30 = vpop.f32.mrb[17].mxu1  ;;  %1971 = vmatmul.mubr.msk.f32.gmra.mrb[12].mxu0 %vm391_vm2, %v376_v23 }
 0x1da   :  { %v377_v31 = vmul.f32 %v354_v30, %v151_v27 }
 0x1dc   :  { %1973 = vmatprep.mubr.msk.f32.mxu0 %vm391_vm2, %v377_v31 }
 0x1dd   :  { %1974 = vmatmul.mubr.msk.f32.gmra.mrb[14].mxu0 %vm391_vm2, %v378_v29 }
 0x294   :  { %v2762_v32 = vpop.f32.mrb[0].mxu0 }
 0x295   :  { %v506_v33 = vpop.f32.mrb[1].mxu0 }
 0x296   :  { %v2361_v34 = vpack.i.bf16 %v2762_v32, %v506_v33  ;;  %2008 = vmatprep.mubr.msk.f32.mxu1 %vm633_vm3, %v506_v33 }
 0x298   :  { %2322 = vrot.lane.b32.xlu0 %v2361_v34, %s2505_s17  ;;  %v2767_v35 = vpop.f32.mrb[2].mxu0 }
 0x299   :  { %v2769_v36 = vpop.f32.mrb[3].mxu0 }
 0x29a   :  { %v2366_v37 = vpack.i.bf16 %v2767_v35, %v2769_v36 }
 0x29c   :  { %2327 = vrot.lane.b32.xlu0 %v2366_v37, %s2505_s17  ;;  %v2774_v38 = vpop.f32.mrb[4].mxu0 }
 0x29d   :  { %v2776_v39 = vpop.f32.mrb[5].mxu0 }
 0x29e   :  { %v2371_v40 = vpack.i.bf16 %v2774_v38, %v2776_v39 }
 0x2a0   :  { %2332 = vrot.lane.b32.xlu1 %v2371_v40, %s2505_s17  ;;  %v2781_v41 = vpop.f32.mrb[6].mxu0 }
 0x2a1   :  { %v2783_v42 = vpop.f32.mrb[7].mxu0 }
 0x2a2   :  { %v2376_v43 = vpack.i.bf16 %v2781_v41, %v2783_v42 }
 0x2a4   :  { %v2787_v44 = vpop.f32.mrb[8].mxu0  ;;  %2337 = vrot.lane.b32.xlu1 %v2376_v43, %s2505_s17 }
 0x2a5   :  { %v2790_v45 = vpop.f32.mrb[9].mxu0 }
 0x2a6   :  { %v2381_v46 = vpack.i.bf16 %v2787_v44, %v2790_v45 }
 0x2a8   :  { %v2794_v47 = vpop.f32.mrb[10].mxu0  ;;  %2342 = vrot.lane.b32.xlu0 %v2381_v46, %s2505_s17 }
 0x2a9   :  { %v2797_v48 = vpop.f32.mrb[11].mxu0 }
 0x2aa   :  { %v2801_v49 = vpack.i.bf16 %v2794_v47, %v2797_v48 }
 0x2ac   :  { %v2803_v50 = vpop.f32.mrb[12].mxu0  ;;  %2347 = vrot.lane.b32.xlu1 %v2801_v49, %s2505_s17 }
 0x2ad   :  { %v2807_v51 = vpop.f32.mrb[13].mxu0 }
 0x2ae   :  { %v2811_v52 = vpack.i.bf16 %v2803_v50, %v2807_v51 }
 0x2b0   :  { %2352 = vrot.lane.b32.xlu0 %v2811_v52, %s2505_s17  ;;  %v2815_v53 = vpop.f32.mrb[14].mxu0 }
 0x2b1   :  { %v2817_v54 = vpop.f32.mrb[15].mxu0 }
 0x2b2   :  { %v2821_v55 = vpack.i.bf16 %v2815_v53, %v2817_v54 }
 0x2b4   :  { %2367 = vrot.lane.b32.xlu0 %v2366_v37, %s2506_s18  ;;  %2357 = vrot.lane.b32.xlu1 %v2821_v55, %s2505_s17 }
 0x2b8   :  { %2377 = vrot.lane.b32.xlu0 %v2376_v43, %s2506_s18  ;;  %2362 = vrot.lane.b32.xlu1 %v2361_v34, %s2506_s18 }
 0x2bc   :  { %2372 = vrot.lane.b32.xlu1 %v2371_v40, %s2506_s18 }
 0x2c0   :  { %2382 = vrot.lane.b32.xlu1 %v2381_v46, %s2506_s18 }
 0x30a   :  { %v2323_v56 = vpop.permute.xlu0 %2322 }
 0x30b   :  { %v2325_v57 = vunpack.i.h.bf16 %v2323_v56  ;;  %v2324_v58 = vunpack.i.l.bf16 %v2323_v56 }
 0x30d   :  { %v2196_v60 = vpack.c.bf16 %v2325_v57, %v2324_v58 }
 0x30e   :  { %v2328_v61 = vpop.permute.xlu0 %2327 }
 0x30f   :  { %2198 = vmatprep.subr.msk.bf16.mxu1 %vm2832_vm4, %v2196_v60  ;;  %v2330_v62 = vunpack.i.h.bf16 %v2328_v61  ;;  %v2329_v63 = vunpack.i.l.bf16 %v2328_v61 }
 0x310   :  { %2201 = vmatpush3.bf16.xpose.msk.msra.mxu1 %vm2832_vm4, %v2196_v60 }
 0x311   :  { %v2202_v0 = vpack.c.bf16 %v2330_v62, %v2329_v63 }
 0x312   :  { %v2333_v1 = vpop.permute.xlu1 %2332 }
 0x313   :  { %2204 = vmatprep.subr.msk.bf16.mxu1 %vm2832_vm4, %v2202_v0  ;;  %v2335_v2 = vunpack.i.h.bf16 %v2333_v1  ;;  %v2334_v3 = vunpack.i.l.bf16 %v2333_v1 }
 0x315   :  { %v2208_v4 = vpack.c.bf16 %v2335_v2, %v2334_v3 }
 0x316   :  { %v2338_v5 = vpop.permute.xlu1 %2337 }
 0x317   :  { %v2340_v6 = vunpack.i.h.bf16 %v2338_v5  ;;  %v2339_v7 = vunpack.i.l.bf16 %v2338_v5 }
 0x318   :  { %2207 = vmatpush3.bf16.xpose.msk.msra.mxu1 %vm2832_vm4, %v2202_v0  ;;  %v847_v0 = vld [vmem:[%s3232_s0 + $0x20] sm:$0xff] }
 0x319   :  { %2210 = vmatprep.subr.msk.bf16.mxu1 %vm2832_vm4, %v2208_v4  ;;  %v2214_v9 = vpack.c.bf16 %v2340_v6, %v2339_v7  ;;  %v877_v6 = vld [vmem:[%s3233_s1 + $0x10] sm:$0xff]  ;;  %v879_v7 = vld [vmem:[%s3233_s1 + $0x20] sm:$0xff] }
 0x31a   :  { %v2343_v8 = vpop.permute.xlu0 %2342 }
 0x31b   :  { %v2345_v11 = vunpack.i.h.bf16 %v2343_v8  ;;  %v2344_v12 = vunpack.i.l.bf16 %v2343_v8 }
 0x31d   :  { %v2220_v14 = vpack.c.bf16 %v2345_v11, %v2344_v12 }
 0x31e   :  { %v2348_v10 = vpop.permute.xlu1 %2347 }
 0x31f   :  { %v2350_v17 = vunpack.i.h.bf16 %v2348_v10  ;;  %v2349_v18 = vunpack.i.l.bf16 %v2348_v10 }
 0x320   :  { %2213 = vmatpush3.bf16.xpose.msk.msra.mxu1 %vm2832_vm4, %v2208_v4  ;;  %v848_v4 = vld [vmem:[%s3232_s0 + $0x28] sm:$0xff] }
 0x321   :  { %2216 = vmatprep.subr.msk.bf16.mxu1 %vm2832_vm4, %v2214_v9  ;;  %v2226_v24 = vpack.c.bf16 %v2350_v17, %v2349_v18  ;;  %v881_v17 = vld [vmem:[%s3233_s1 + $0x30] sm:$0xff] }
 0x322   :  { %v2353_v13 = vpop.permute.xlu0 %2352 }
 0x323   :  { %v2355_v31 = vunpack.i.h.bf16 %v2353_v13  ;;  %v2354_v33 = vunpack.i.l.bf16 %v2353_v13 }
 0x325   :  { %v2232_v46 = vpack.c.bf16 %v2355_v31, %v2354_v33 }
 0x326   :  { %v2358_v15 = vpop.permute.xlu1 %2357  ;;  %v2368_v16 = vpop.permute.xlu0 %2367 }
 0x327   :  { %v2370_v20 = vunpack.i.h.bf16 %v2368_v16  ;;  %v2369_v21 = vunpack.i.l.bf16 %v2368_v16  ;;  %v2360_v60 = vunpack.i.h.bf16 %v2358_v15  ;;  %v2359_v61 = vunpack.i.l.bf16 %v2358_v15  ;;  %v880_v16 = vld [vmem:[%s3233_s1 + $0x28] sm:$0xff] }
 0x328   :  { %2219 = vmatpush3.bf16.xpose.msk.msra.mxu1 %vm2832_vm4, %v2214_v9  ;;  %v849_v9 = vld [vmem:[%s3232_s0 + $0x30] sm:$0xff] }
 0x329   :  { %2222 = vmatprep.subr.msk.bf16.mxu1 %vm2832_vm4, %v2220_v14  ;;  %v2248_v27 = vpack.c.bf16 %v2370_v20, %v2369_v21  ;;  %v2238_v63 = vpack.c.bf16 %v2360_v60, %v2359_v61 }
 0x32a   :  { %v2363_v19 = vpop.permute.xlu1 %2362  ;;  %v2378_v30 = vpop.permute.xlu0 %2377 }
 0x32b   :  { %v2365_v22 = vunpack.i.h.bf16 %v2363_v19  ;;  %v2364_v23 = vunpack.i.l.bf16 %v2363_v19  ;;  %v2380_v34 = vunpack.i.h.bf16 %v2378_v30  ;;  %v2379_v37 = vunpack.i.l.bf16 %v2378_v30  ;;  %v851_v19 = vld [vmem:[%s3232_s0 + $0x40] sm:$0xff] }
 0x32d   :  { %v2244_v25 = vpack.c.bf16 %v2365_v22, %v2364_v23  ;;  %v2256_v56 = vpack.c.bf16 %v2380_v34, %v2379_v37  ;;  %v854_v37 = vld [vmem:[%s3232_s0 + $0x58] sm:$0xff] }
 0x32e   :  { %v2373_v26 = vpop.permute.xlu1 %2372 }
 0x32f   :  { %v2375_v28 = vunpack.i.h.bf16 %v2373_v26  ;;  %v2374_v29 = vunpack.i.l.bf16 %v2373_v26  ;;  %2245 = vmatprep.subr.bf16.mxu0 %v2244_v25  ;;  %v882_v26 = vld [vmem:[%s3233_s1 + $0x38] sm:$0xff] }
 0x330   :  { %2225 = vmatpush3.bf16.xpose.msk.msra.mxu1 %vm2832_vm4, %v2220_v14  ;;  %2247 = vmatpush3.bf16.msra.mxu0 %v2244_v25  ;;  %v850_v14 = vld [vmem:[%s3232_s0 + $0x38] sm:$0xff] }
 0x331   :  { %2249 = vmatprep.subr.bf16.mxu0 %v2248_v27  ;;  %2228 = vmatprep.subr.msk.bf16.mxu1 %vm2832_vm4, %v2226_v24  ;;  %v2252_v40 = vpack.c.bf16 %v2375_v28, %v2374_v29  ;;  %v853_v29 = vld [vmem:[%s3232_s0 + $0x50] sm:$0xff] }
 0x332   :  { %v2383_v43 = vpop.permute.xlu1 %2382 }
 0x333   :  { %v2385_v57 = vunpack.i.h.bf16 %v2383_v43  ;;  %v2384_v58 = vunpack.i.l.bf16 %v2383_v43  ;;  %v884_v43 = vld [vmem:[%s3233_s1 + $0x48] sm:$0xff] }
 0x334   :  { %2251 = vmatpush3.bf16.msra.mxu0 %v2248_v27  ;;  %v883_v27 = vld [vmem:[%s3233_s1 + $0x40] sm:$0xff] }
 0x335   :  { %2253 = vmatprep.subr.bf16.mxu0 %v2252_v40  ;;  %v2260_v62 = vpack.c.bf16 %v2385_v57, %v2384_v58  ;;  %v855_v57 = vld [vmem:[%s3232_s0 + $0x60] sm:$0xff] }
 0x338   :  { %2231 = vmatpush3.bf16.xpose.msk.msra.mxu1 %vm2832_vm4, %v2226_v24  ;;  %2255 = vmatpush3.bf16.msra.mxu0 %v2252_v40  ;;  %v852_v24 = vld [vmem:[%s3232_s0 + $0x48] sm:$0xff] }
 0x339   :  { %2257 = vmatprep.subr.bf16.mxu0 %v2256_v56  ;;  %2234 = vmatprep.subr.msk.bf16.mxu1 %vm2832_vm4, %v2232_v46 }
 0x33c   :  { %2259 = vmatpush3.bf16.msra.mxu0 %v2256_v56 }
 0x33d   :  { %2261 = vmatprep.subr.bf16.mxu0 %v2260_v62 }
 0x340   :  { %2237 = vmatpush3.bf16.xpose.msk.msra.mxu1 %vm2832_vm4, %v2232_v46  ;;  %2263 = vmatpush3.bf16.msra.mxu0 %v2260_v62  ;;  %v885_v46 = vld [vmem:[%s3233_s1 + $0x50] sm:$0xff] }
 0x341   :  { %2240 = vmatprep.subr.msk.bf16.mxu1 %vm2832_vm4, %v2238_v63 }
 0x348   :  { %2243 = vmatpush3.bf16.xpose.msk.msra.mxu1 %vm2832_vm4, %v2238_v63  ;;  %v856_v63 = vld [vmem:[%s3232_s0 + $0x68] sm:$0xff] }
 0x34f   :  { %2009 = vmatmul.mubr.msk.f32.vlgmr.msra.gmra.mrb[18].mxu1 %vm633_vm3, %v2762_v32  ;;  %v844_v32 = vld [vmem:[%s3232_s0 + $0x8] sm:$0xff] }
 0x350   :  { %2011 = vmatprep.mubr.msk.f32.mxu1 %vm633_vm3, %v2769_v36 }
 0x353   :  { %2012 = vmatmul.mubr.msk.f32.gmra.mrb[20].mxu1 %vm633_vm3, %v2767_v35  ;;  %v843_v35 = vld [vmem:[%s3232_s0] sm:$0xff] }
 0x354   :  { %2014 = vmatprep.mubr.msk.f32.mxu1 %vm633_vm3, %v2776_v39 }
 0x357   :  { %2015 = vmatmul.mubr.msk.f32.gmra.mrb[22].mxu1 %vm633_vm3, %v2774_v38  ;;  %v876_v38 = vld [vmem:[%s3233_s1 + $0x8] sm:$0xff] }
 0x358   :  { %2017 = vmatprep.mubr.msk.f32.mxu1 %vm633_vm3, %v2783_v42  ;;  %v875_v42 = vld [vmem:[%s3233_s1] sm:$0xff] }
 0x35b   :  { %2018 = vmatmul.mubr.msk.f32.gmra.mrb[24].mxu1 %vm633_vm3, %v2781_v41 }
 0x35c   :  { %2020 = vmatprep.mubr.msk.f32.mxu1 %vm633_vm3, %v2790_v45  ;;  %v846_v45 = vld [vmem:[%s3232_s0 + $0x18] sm:$0xff] }
 0x35f   :  { %2021 = vmatmul.mubr.msk.f32.gmra.mrb[26].mxu1 %vm633_vm3, %v2787_v44 }
 0x360   :  { %2023 = vmatprep.mubr.msk.f32.mxu1 %vm633_vm3, %v2797_v48 }
 0x363   :  { %2024 = vmatmul.mubr.msk.f32.gmra.mrb[28].mxu1 %vm633_vm3, %v2794_v47 }
 0x364   :  { %2026 = vmatprep.mubr.msk.f32.mxu1 %vm633_vm3, %v2807_v51  ;;  %v878_v51 = vld [vmem:[%s3233_s1 + $0x18] sm:$0xff] }
 0x367   :  { %2027 = vmatmul.mubr.msk.f32.gmra.mrb[30].mxu1 %vm633_vm3, %v2803_v50 }
 0x368   :  { %2029 = vmatprep.mubr.msk.f32.mxu1 %vm633_vm3, %v2817_v54 }
 0x36b   :  { %2030 = vmatmul.mubr.msk.f32.gmra.mrb[32].mxu1 %vm633_vm3, %v2815_v53 }
 0x422   :  { %v2010_v36 = vpop.f32.mrb[18].mxu1 }
 0x423   :  { %v860_v39 = vmul.f32 %v2010_v36, %v844_v32  ;;  %v764_v41 = vpop.f32.mrb[19].mxu1  ;;  %v887_v36 = vld [vmem:[%s3233_s1 + $0x60] sm:$0xff] }
 0x424   :  { %v859_v44 = vmul.f32 %v843_v35, %v764_v41  ;;  %v886_v35 = vld [vmem:[%s3233_s1 + $0x58] sm:$0xff] }
 0x425   :  { %v2913_v47 = vadd.f32 %v876_v38, %v860_v39  ;;  %v857_v39 = vld [vmem:[%s3232_s0 + $0x70] sm:$0xff] }
 0x426   :  { %v2013_v48 = vpop.f32.mrb[20].mxu1  ;;  %v2915_v50 = vadd.f32 %v875_v42, %v859_v44 }
 0x427   :  { %v862_v53 = vmul.f32 %v2013_v48, %v846_v45  ;;  %909 = vmax.xlane.f32.xlu1 %v2913_v47  ;;  %v774_v54 = vpop.f32.mrb[21].mxu1  ;;  %v858_v48 = vld [vmem:[%s3232_s0 + $0x78] sm:$0xff] }
 0x428   :  { %907 = vmax.xlane.f32.xlu0 %v2915_v50  ;;  %v861_v2 = vmul.f32 %v845_v59, %v774_v54  ;;  %v889_v54 = vld [vmem:[%s3233_s1 + $0x70] sm:$0xff] }
 0x429   :  { %v2928_v1 = vadd.f32 %v878_v51, %v862_v53  ;;  %v888_v53 = vld [vmem:[%s3233_s1 + $0x68] sm:$0xff] }
 0x42a   :  { %v2016_v3 = vpop.f32.mrb[22].mxu1  ;;  %v2943_v12 = vadd.f32 %v877_v6, %v861_v2 }
 0x42b   :  { %v784_v5 = vpop.f32.mrb[23].mxu1  ;;  %v864_v10 = vmul.f32 %v2016_v3, %v848_v4  ;;  %v890_v4 = vld [vmem:[%s3233_s1 + $0x78] sm:$0xff] }
 0x42c   :  { %v863_v8 = vmul.f32 %v847_v0, %v784_v5  ;;  %913 = vmax.xlane.f32.xlu0 %v2928_v1 }
 0x42d   :  { %v2961_v22 = vadd.f32 %v880_v16, %v864_v10 }
 0x42e   :  { %v2019_v11 = vpop.f32.mrb[24].mxu1  ;;  %v2945_v13 = vadd.f32 %v879_v7, %v863_v8 }
 0x42f   :  { %v794_v15 = vpop.f32.mrb[25].mxu1  ;;  %v866_v20 = vmul.f32 %v2019_v11, %v850_v14 }
 0x430   :  { %v865_v18 = vmul.f32 %v849_v9, %v794_v15  ;;  %911 = vmax.xlane.f32.xlu0 %v2943_v12  ;;  %915 = vmax.xlane.f32.xlu1 %v2945_v13 }
 0x431   :  { %v2979_v33 = vadd.f32 %v882_v26, %v866_v20 }
 0x432   :  { %v2022_v21 = vpop.f32.mrb[26].mxu1  ;;  %v2963_v23 = vadd.f32 %v881_v17, %v865_v18 }
 0x433   :  { %v804_v25 = vpop.f32.mrb[27].mxu1  ;;  %v868_v30 = vmul.f32 %v2022_v21, %v852_v24 }
 0x434   :  { %v867_v28 = vmul.f32 %v851_v19, %v804_v25  ;;  %917 = vmax.xlane.f32.xlu0 %v2961_v22  ;;  %919 = vmax.xlane.f32.xlu1 %v2963_v23 }
 0x435   :  { %v2997_v61 = vadd.f32 %v884_v43, %v868_v30 }
 0x436   :  { %v2025_v31 = vpop.f32.mrb[28].mxu1  ;;  %v2981_v34 = vadd.f32 %v883_v27, %v867_v28 }
 0x437   :  { %v814_v40 = vpop.f32.mrb[29].mxu1  ;;  %v870_v58 = vmul.f32 %v2025_v31, %v854_v37 }
 0x438   :  { %v869_v56 = vmul.f32 %v853_v29, %v814_v40  ;;  %921 = vmax.xlane.f32.xlu0 %v2979_v33  ;;  %923 = vmax.xlane.f32.xlu1 %v2981_v34 }
 0x439   :  { %v3015_v44 = vadd.f32 %v886_v35, %v870_v58 }
 0x43a   :  { %v2028_v60 = vpop.f32.mrb[30].mxu1  ;;  %v2999_v62 = vadd.f32 %v885_v46, %v869_v56 }
 0x43b   :  { %v824_v32 = vpop.f32.mrb[31].mxu1  ;;  %v872_v41 = vmul.f32 %v2028_v60, %v856_v63 }
 0x43c   :  { %v871_v38 = vmul.f32 %v855_v57, %v824_v32  ;;  %925 = vmax.xlane.f32.xlu0 %v2997_v61  ;;  %927 = vmax.xlane.f32.xlu1 %v2999_v62 }
 0x43d   :  { %v3030_v2 = vadd.f32 %v888_v53, %v872_v41 }
 0x43e   :  { %v2031_v42 = vpop.f32.mrb[32].mxu1  ;;  %v3017_v45 = vadd.f32 %v887_v36, %v871_v38 }
 0x43f   :  { %v834_v51 = vpop.f32.mrb[33].mxu1  ;;  %v874_v0 = vmul.f32 %v2031_v42, %v858_v48 }
 0x440   :  { %v873_v59 = vmul.f32 %v857_v39, %v834_v51  ;;  %929 = vmax.xlane.f32.xlu0 %v3015_v44  ;;  %931 = vmax.xlane.f32.xlu1 %v3017_v45 }
 0x441   :  { %v3039_v5 = vadd.f32 %v890_v4, %v874_v0 }
 0x442   :  { %v3032_v3 = vadd.f32 %v889_v54, %v873_v59 }
 0x444   :  { %933 = vmax.xlane.f32.xlu0 %v3030_v2  ;;  %935 = vmax.xlane.f32.xlu1 %v3032_v3 }
 0x448   :  { %937 = vmax.xlane.f32.xlu0 %v3039_v5 }
 0x455   :  { %2387 = vrot.lane.b32.xlu1 %v2801_v49, %s2506_s18 }
 0x45e   :  { %2392 = vrot.lane.b32.xlu0 %v2811_v52, %s2506_s18 }
 0x4b4   :  { %v910_v6 = vpop.xlane.xlu1 %909 }
 0x4b5   :  { %v940_v7 = vsub.f32 %v2913_v47, %v910_v6  ;;  %v908_v8 = vpop.xlane.xlu0 %907 }
 0x4b6   :  { %v939_v9 = vsub.f32 %v2915_v50, %v908_v8 }
 0x4b7   :  { %v957_v10 = vmul.f32 1.442695, %v940_v7 }
 0x4b8   :  { %v955_v11 = vmul.f32 1.442695, %v939_v9 }
 0x4b9   :  { %2401 = vpow2.f32 %v957_v10  ;;  %v914_v14 = vpop.xlane.xlu0 %913 }
 0x4ba   :  { %2403 = vpow2.f32 %v955_v11  ;;  %v942_v15 = vsub.f32 %v2928_v1, %v914_v14 }
 0x4bc   :  { %v961_v16 = vmul.f32 1.442695, %v942_v15 }
 0x4bd   :  { %v912_v17 = vpop.xlane.xlu0 %911  ;;  %v916_v18 = vpop.xlane.xlu1 %915 }
 0x4be   :  { %2405 = vpow2.f32 %v961_v16  ;;  %v941_v49 = vsub.f32 %v2943_v12, %v912_v17  ;;  %v943_v52 = vsub.f32 %v2945_v13, %v916_v18 }
 0x4c0   :  { %v959_v19 = vmul.f32 1.442695, %v941_v49  ;;  %v963_v47 = vmul.f32 1.442695, %v943_v52 }
 0x4c1   :  { %v918_v20 = vpop.xlane.xlu0 %917  ;;  %v920_v21 = vpop.xlane.xlu1 %919 }
 0x4c2   :  { %2407 = vpow2.f32 %v959_v19  ;;  %v944_v50 = vsub.f32 %v2961_v22, %v918_v20  ;;  %v945_v12 = vsub.f32 %v2963_v23, %v920_v21 }
 0x4c3   :  { %v3052_v24 = vpop.eup %2401  ;;  %2409 = vpow2.f32 %v963_v47 }
 0x4c4   :  { %v3054_v25 = vpop.eup %2403  ;;  %v965_v1 = vmul.f32 1.442695, %v944_v50  ;;  %989 = vadd.xlane.f32.xlu0 %v3052_v24  ;;  %v967_v31 = vmul.f32 1.442695, %v945_v12 }
 0x4c5   :  { %v922_v26 = vpop.xlane.xlu0 %921  ;;  %v924_v27 = vpop.xlane.xlu1 %923  ;;  %987 = vadd.xlane.f32.xlu1 %v3054_v25 }
 0x4c6   :  { %2411 = vpow2.f32 %v965_v1  ;;  %v946_v13 = vsub.f32 %v2979_v33, %v922_v26  ;;  %v947_v37 = vsub.f32 %v2981_v34, %v924_v27 }
 0x4c8   :  { %v3060_v28 = vpop.eup %2405  ;;  %v969_v22 = vmul.f32 1.442695, %v946_v13  ;;  %v971_v23 = vmul.f32 1.442695, %v947_v37 }
 0x4c9   :  { %v926_v29 = vpop.xlane.xlu0 %925  ;;  %v928_v30 = vpop.xlane.xlu1 %927  ;;  %993 = vadd.xlane.f32.xlu0 %v3060_v28 }
 0x4ca   :  { %2413 = vpow2.f32 %v969_v22  ;;  %v949_v33 = vsub.f32 %v2999_v62, %v928_v30 }
 0x4cb   :  { %2415 = vpow2.f32 %v967_v31 }
 0x4cc   :  { %v3064_v40 = vpop.eup %2407  ;;  %2417 = vpow2.f32 %v971_v23  ;;  %v975_v63 = vmul.f32 1.442695, %v949_v33 }
 0x4cd   :  { %v3066_v43 = vpop.eup %2409  ;;  %v930_v46 = vpop.xlane.xlu0 %929  ;;  %991 = vadd.xlane.f32.xlu0 %v3064_v40 }
 0x4ce   :  { %v932_v56 = vpop.xlane.xlu1 %931  ;;  %995 = vadd.xlane.f32.xlu1 %v3066_v43  ;;  %2419 = vpow2.f32 %v975_v63  ;;  %v950_v10 = vsub.f32 %v3015_v44, %v930_v46 }
 0x4cf   :  { %v951_v58 = vsub.f32 %v3017_v45, %v932_v56 }
 0x4d0   :  { %v3071_v57 = vpop.eup %2411  ;;  %v977_v11 = vmul.f32 1.442695, %v950_v10 }
 0x4d1   :  { %v934_v60 = vpop.xlane.xlu0 %933  ;;  %997 = vadd.xlane.f32.xlu0 %v3071_v57  ;;  %v979_v35 = vmul.f32 1.442695, %v951_v58 }
 0x4d2   :  { %v936_v34 = vpop.xlane.xlu1 %935  ;;  %v952_v14 = vsub.f32 %v3030_v2, %v934_v60 }
 0x4d3   :  { %v953_v62 = vsub.f32 %v3032_v3, %v936_v34  ;;  %2421 = vpow2.f32 %v979_v35 }
 0x4d4   :  { %v3075_v32 = vpop.eup %2413  ;;  %v981_v15 = vmul.f32 1.442695, %v952_v14 }
 0x4d5   :  { %1001 = vadd.xlane.f32.xlu0 %v3075_v32  ;;  %v938_v36 = vpop.xlane.xlu0 %937  ;;  %v3079_v42 = vpop.eup %2415  ;;  %v983_v51 = vmul.f32 1.442695, %v953_v62 }
 0x4d6   :  { %v2388_v38 = vpop.permute.xlu1 %2387  ;;  %v954_v53 = vsub.f32 %v3039_v5, %v938_v36  ;;  %v3083_v0 = vpop.eup %2417 }
 0x4d7   :  { %v2390_v39 = vunpack.i.h.bf16 %v2388_v38  ;;  %v2389_v41 = vunpack.i.l.bf16 %v2388_v38  ;;  %2423 = vpow2.f32 %v983_v51 }
 0x4d8   :  { %v985_v3 = vmul.f32 1.442695, %v954_v53  ;;  %v3088_v6 = vpop.eup %2419 }
 0x4d9   :  { %v2264_v45 = vpack.c.bf16 %v2390_v39, %v2389_v41  ;;  %999 = vadd.xlane.f32.xlu0 %v3079_v42  ;;  %v2393_v48 = vpop.permute.xlu0 %2392 }
 0x4da   :  { %v2395_v54 = vunpack.i.h.bf16 %v2393_v48  ;;  %v2394_v59 = vunpack.i.l.bf16 %v2393_v48  ;;  %2425 = vpow2.f32 %v985_v3 }
 0x4db   :  { %2265 = vmatprep.subr.bf16.mxu0 %v2264_v45 }
 0x4dc   :  { %2267 = vmatpush3.bf16.msra.mxu0 %v2264_v45  ;;  %v2268_v4 = vpack.c.bf16 %v2395_v54, %v2394_v59 }
 0x4dd   :  { %1003 = vadd.xlane.f32.xlu0 %v3083_v0  ;;  %v3091_v5 = vpop.eup %2421 }
 0x4de   :  { %2269 = vmatprep.subr.bf16.mxu0 %v2268_v4 }
 0x4df   :  { %2397 = vrot.lane.b32.xlu1 %v2821_v55, %s2506_s18  ;;  %v948_v55 = vsub.f32 %v2997_v61, %v926_v29 }
 0x4e0   :  { %2271 = vmatpush3.bf16.msra.mxu0 %v2268_v4 }
 0x4e1   :  { %1007 = vadd.xlane.f32.xlu0 %v3088_v6  ;;  %v3094_v7 = vpop.eup %2423  ;;  %v973_v9 = vmul.f32 1.442695, %v948_v55  ;;  %v1244_v55 = vld [vmem:[%s3240_s8] sm:$0xf] }
 0x4e3   :  { %2427 = vpow2.f32 %v973_v9 }
 0x4e4   :  { %v3097_v8 = vpop.eup %2425  ;;  %2429 = vpow2.f32 %v977_v11 }
 0x4e5   :  { %1011 = vadd.xlane.f32.xlu0 %v3091_v5  ;;  %2431 = vpow2.f32 %v981_v15 }
 0x4e9   :  { %1015 = vadd.xlane.f32.xlu0 %v3094_v7 }
 0x4ed   :  { %1017 = vadd.xlane.f32.xlu0 %v3097_v8  ;;  %v3103_v16 = vpop.eup %2427 }
 0x4ee   :  { %v3106_v17 = vpop.eup %2429 }
 0x4ef   :  { %v3109_v18 = vpop.eup %2431 }
 0x503   :  { %1005 = vadd.xlane.f32.xlu1 %v3103_v16 }
 0x507   :  { %1009 = vadd.xlane.f32.xlu1 %v3106_v17 }
 0x50b   :  { %1013 = vadd.xlane.f32.xlu1 %v3109_v18 }
 0x551   :  { %v990_v61 = vpop.xlane.xlu0 %989 }
 0x552   :  { %v988_v44 = vpop.xlane.xlu1 %987 }
 0x553   :  { %2433 = vrcp.f32 %v988_v44 }
 0x554   :  { %2435 = vrcp.f32 %v990_v61 }
 0x556   :  { %v994_v49 = vpop.xlane.xlu0 %993 }
 0x55a   :  { %v992_v2 = vpop.xlane.xlu0 %991 }
 0x55b   :  { %2437 = vrcp.f32 %v992_v2  ;;  %v996_v52 = vpop.xlane.xlu1 %995 }
 0x55c   :  { %2439 = vrcp.f32 %v994_v49 }
 0x55d   :  { %v2434_v19 = vpop.eup %2433  ;;  %2441 = vrcp.f32 %v996_v52 }
 0x55e   :  { %v998_v47 = vpop.xlane.xlu0 %997  ;;  %v1035_v20 = vmul.f32 %v2434_v19, %v3054_v25  ;;  %v2436_v12 = vpop.eup %2435  ;;  %v1458_v19 = vld [vmem:[%s3241_s9] sm:$0xff] }
 0x55f   :  { %v2398_v21 = vpop.permute.xlu1 %2397  ;;  %2443 = vrcp.f32 %v998_v47  ;;  %v1036_v22 = vmul.f32 %v2436_v12, %v3052_v24  ;;  %2146 = vmatprep.mubr.f32.mxu1 %v1458_v19 }
 0x560   :  { %v2400_v50 = vunpack.i.h.bf16 %v2398_v21  ;;  %v2399_v1 = vunpack.i.l.bf16 %v2398_v21  ;;  %2064 = vmatprep.mubr.f32.mxu0 %v1035_v20  ;;  %v2465_v20 = vld [vmem:[%s3238_s6 + $0x8] sm:$0xff] }
 0x562   :  { %v2272_v26 = vpack.c.bf16 %v2400_v50, %v2399_v1  ;;  %v1002_v27 = vpop.xlane.xlu0 %1001  ;;  %v2466_v1 = vld [vmem:[%s3238_s6] sm:$0xff] }
 0x563   :  { %2445 = vrcp.f32 %v1002_v27 }
 0x564   :  { %2273 = vmatprep.subr.bf16.mxu0 %v2272_v26 }
 0x565   :  { %v2438_v13 = vpop.eup %2437  ;;  %2275 = vmatpush3.bf16.msra.mxu0 %v2272_v26 }
 0x566   :  { %v1000_v29 = vpop.xlane.xlu0 %999  ;;  %v1037_v30 = vmul.f32 %v2438_v13, %v3064_v40  ;;  %v2440_v31 = vpop.eup %2439  ;;  %2088 = vmatprep.subr.msk.mxu0 %vm1293_vm5, %v1244_v55  ;;  %v2467_v13 = vld [vmem:[%s3238_s6 + $0x18] sm:$0xff] }
 0x567   :  { %2447 = vrcp.f32 %v1000_v29  ;;  %v2442_v25 = vpop.eup %2441  ;;  %v1038_v46 = vmul.f32 %v2440_v31, %v3060_v28 }
 0x568   :  { %2065 = vmatmul.mubr.f32.vlgmr.msra.gmra.mrb[16].mxu0 %v1036_v22  ;;  %v1039_v23 = vmul.f32 %v2442_v25, %v3066_v43 }
 0x569   :  { %2067 = vmatprep.mubr.f32.mxu0 %v1037_v30  ;;  %v2444_v56 = vpop.eup %2443  ;;  %2089 = vmatpush3.msk.msra.mxu0 %vm1293_vm5, %v1244_v55  ;;  %v2468_v30 = vld [vmem:[%s3238_s6 + $0x10] sm:$0xff]  ;;  %v2478_v55 = vld [vmem:[%s3238_s6 + $0x60] sm:$0xff] }
 0x56a   :  { %v1004_v37 = vpop.xlane.xlu0 %1003  ;;  %v1040_v24 = vmul.f32 %v2444_v56, %v3071_v57 }
 0x56b   :  { %2449 = vrcp.f32 %v1004_v37 }
 0x56c   :  { %2068 = vmatmul.mubr.f32.gmra.mrb[18].mxu0 %v1038_v46  ;;  %v2469_v46 = vld [vmem:[%s3238_s6 + $0x28] sm:$0xff] }
 0x56d   :  { %2070 = vmatprep.mubr.f32.mxu0 %v1039_v23  ;;  %v2446_v33 = vpop.eup %2445 }
 0x56e   :  { %v1042_v60 = vmul.f32 %v2446_v33, %v3075_v32  ;;  %v1008_v63 = vpop.xlane.xlu0 %1007 }
 0x56f   :  { %2451 = vrcp.f32 %v1008_v63  ;;  %v2472_v63 = vld [vmem:[%s3238_s6 + $0x30] sm:$0xff] }
 0x570   :  { %2071 = vmatmul.mubr.f32.gmra.mrb[20].mxu0 %v1040_v24  ;;  %v2470_v24 = vld [vmem:[%s3238_s6 + $0x20] sm:$0xff] }
 0x571   :  { %v2448_v58 = vpop.eup %2447 }
 0x572   :  { %v1041_v40 = vmul.f32 %v2448_v58, %v3079_v42  ;;  %v1012_v35 = vpop.xlane.xlu0 %1011 }
 0x574   :  { %2073 = vmatprep.mubr.f32.mxu0 %v1041_v40 }
 0x575   :  { %v2450_v34 = vpop.eup %2449  ;;  %2074 = vmatmul.mubr.f32.gmra.mrb[22].mxu0 %v1042_v60  ;;  %v2471_v60 = vld [vmem:[%s3238_s6 + $0x38] sm:$0xff] }
 0x576   :  { %v1043_v28 = vmul.f32 %v2450_v34, %v3083_v0  ;;  %v1016_v36 = vpop.xlane.xlu0 %1015 }
 0x578   :  { %2076 = vmatprep.mubr.f32.mxu0 %v1043_v28 }
 0x579   :  { %v2452_v32 = vpop.eup %2451 }
 0x57a   :  { %v1018_v38 = vpop.xlane.xlu0 %1017  ;;  %v1045_v42 = vmul.f32 %v2452_v32, %v3088_v6  ;;  %v2474_v32 = vld [vmem:[%s3238_s6 + $0x40] sm:$0xff] }
 0x590   :  { %v1006_v43 = vpop.xlane.xlu1 %1005 }
 0x591   :  { %2453 = vrcp.f32 %v1006_v43 }
 0x592   :  { %2455 = vrcp.f32 %v1012_v35 }
 0x594   :  { %v1010_v57 = vpop.xlane.xlu1 %1009 }
 0x595   :  { %2457 = vrcp.f32 %v1010_v57  ;;  %v2473_v57 = vld [vmem:[%s3238_s6 + $0x48] sm:$0xff] }
 0x596   :  { %2459 = vrcp.f32 %v1016_v36 }
 0x598   :  { %v1014_v62 = vpop.xlane.xlu1 %1013 }
 0x599   :  { %2461 = vrcp.f32 %v1014_v62 }
 0x59a   :  { %2463 = vrcp.f32 %v1018_v38 }
 0x59b   :  { %v2454_v39 = vpop.eup %2453 }
 0x59c   :  { %v1044_v41 = vmul.f32 %v2454_v39, %v3103_v16  ;;  %v2456_v45 = vpop.eup %2455 }
 0x59d   :  { %v1047_v53 = vmul.f32 %v2456_v45, %v3091_v5  ;;  %v2475_v45 = vld [vmem:[%s3238_s6 + $0x58] sm:$0xff] }
 0x59e   :  { %2077 = vmatmul.mubr.f32.gmra.mrb[24].mxu0 %v1044_v41 }
 0x59f   :  { %v2458_v48 = vpop.eup %2457  ;;  %2079 = vmatprep.mubr.f32.mxu0 %v1045_v42 }
 0x5a0   :  { %v1046_v51 = vmul.f32 %v2458_v48, %v3106_v17  ;;  %v2460_v54 = vpop.eup %2459 }
 0x5a1   :  { %v1049_v3 = vmul.f32 %v2460_v54, %v3094_v7 }
 0x5a2   :  { %2080 = vmatmul.mubr.f32.gmra.mrb[26].mxu0 %v1046_v51 }
 0x5a3   :  { %v2462_v59 = vpop.eup %2461  ;;  %2082 = vmatprep.mubr.f32.mxu0 %v1047_v53  ;;  %v2476_v53 = vld [vmem:[%s3238_s6 + $0x50] sm:$0xff] }
 0x5a4   :  { %v1048_v0 = vmul.f32 %v2462_v59, %v3109_v18  ;;  %v2464_v4 = vpop.eup %2463 }
 0x5a5   :  { %v1050_v6 = vmul.f32 %v2464_v4, %v3097_v8  ;;  %v2477_v4 = vld [vmem:[%s3238_s6 + $0x68] sm:$0xff] }
 0x5a6   :  { %2083 = vmatmul.mubr.f32.gmra.mrb[28].mxu0 %v1048_v0 }
 0x5a7   :  { %2085 = vmatprep.mubr.f32.mxu0 %v1049_v3 }
 0x5aa   :  { %2086 = vmatmul.mubr.f32.gmra.mrb[30].mxu0 %v1050_v6 }
 0x63b   :  { %v2066_v5 = vpop.f32.mrb[16].mxu0 }
 0x63c   :  { %v1165_v9 = vpop.f32.mrb[17].mxu0 }
 0x63d   :  { %2090 = vmatprep.mubr.msk.f32.mxu0 %vm633_vm3, %v1165_v9 }
 0x63e   :  { %2091 = vmatmul.mubr.msk.f32.vlgmr.msra.gmra.mrb[32].mxu0 %vm633_vm3, %v2066_v5 }
 0x63f   :  { %v2069_v10 = vpop.f32.mrb[18].mxu0 }
 0x640   :  { %v1175_v7 = vpop.f32.mrb[19].mxu0 }
 0x641   :  { %2093 = vmatprep.mubr.msk.f32.mxu0 %vm633_vm3, %v1175_v7  ;;  %v2479_v7 = vld [vmem:[%s3238_s6 + $0x78] sm:$0xff] }
 0x642   :  { %2094 = vmatmul.mubr.msk.f32.gmra.mrb[34].mxu0 %vm633_vm3, %v2069_v10 }
 0x643   :  { %v2072_v8 = vpop.f32.mrb[20].mxu0 }
 0x644   :  { %v1185_v11 = vpop.f32.mrb[21].mxu0 }
 0x645   :  { %2096 = vmatprep.mubr.msk.f32.mxu0 %vm633_vm3, %v1185_v11 }
 0x646   :  { %2097 = vmatmul.mubr.msk.f32.gmra.mrb[36].mxu0 %vm633_vm3, %v2072_v8 }
 0x648   :  { %v2075_v14 = vpop.f32.mrb[22].mxu0 }
 0x649   :  { %v1195_v15 = vpop.f32.mrb[23].mxu0 }
 0x64a   :  { %2099 = vmatprep.mubr.msk.f32.mxu0 %vm633_vm3, %v1195_v15  ;;  %v1536_v15 = vld [vmem:[%s3242_s10 + $0x8] sm:$0xff] }
 0x64b   :  { %2100 = vmatmul.mubr.msk.f32.gmra.mrb[38].mxu0 %vm633_vm3, %v2075_v14  ;;  %v1535_v14 = vld [vmem:[%s3242_s10] sm:$0xff] }
 0x671   :  { %v2078_v16 = vpop.f32.mrb[24].mxu0 }
 0x672   :  { %v1205_v17 = vpop.f32.mrb[25].mxu0 }
 0x673   :  { %2102 = vmatprep.mubr.msk.f32.mxu0 %vm633_vm3, %v1205_v17 }
 0x674   :  { %2103 = vmatmul.mubr.msk.f32.gmra.mrb[40].mxu0 %vm633_vm3, %v2078_v16  ;;  %v2480_v16 = vld [vmem:[%s3238_s6 + $0x70] sm:$0xff] }
 0x675   :  { %v2081_v18 = vpop.f32.mrb[26].mxu0 }
 0x676   :  { %v1215_v61 = vpop.f32.mrb[27].mxu0 }
 0x677   :  { %2105 = vmatprep.mubr.msk.f32.mxu0 %vm633_vm3, %v1215_v61  ;;  %v2308_v61 = vpack.c.bf16 %v1536_v15, %v1535_v14 }
 0x678   :  { %2106 = vmatmul.mubr.msk.f32.gmra.mrb[42].mxu0 %vm633_vm3, %v2081_v18 }
 0x679   :  { %v2084_v44 = vpop.f32.mrb[28].mxu0 }
 0x67a   :  { %v1225_v49 = vpop.f32.mrb[29].mxu0 }
 0x67b   :  { %2108 = vmatprep.mubr.msk.f32.mxu0 %vm633_vm3, %v1225_v49  ;;  %v1538_v49 = vld [vmem:[%s3242_s10 + $0x18] sm:$0xff] }
 0x67c   :  { %2109 = vmatmul.mubr.msk.f32.gmra.mrb[44].mxu0 %vm633_vm3, %v2084_v44  ;;  %v1537_v44 = vld [vmem:[%s3242_s10 + $0x10] sm:$0xff] }
 0x67d   :  { %v2087_v2 = vpop.f32.mrb[30].mxu0 }
 0x67e   :  { %v1235_v52 = vpop.f32.mrb[31].mxu0 }
 0x67f   :  { %2111 = vmatprep.mubr.msk.f32.mxu0 %vm633_vm3, %v1235_v52  ;;  %v2312_v52 = vpack.c.bf16 %v1538_v49, %v1537_v44 }
 0x680   :  { %2112 = vmatmul.mubr.msk.f32.gmra.mrb[46].mxu0 %vm633_vm3, %v2087_v2  ;;  %v1459_v2 = vld [vmem:[%s3241_s9 + $0x8] sm:$0xff]  ;;  %s2481_s9 = scalar_lea.vmem %s1635_s14, 256 }
 0x681   :  { %p2482_p0 = scmp.ne.s32.totalorder %s1635_s14, %s2481_s9  ;;  %p2487_p2 = scmp.lt.s32.totalorder %s2481_s9, %s2481_s9 }
 0x683   :  { %p2488_p3 = por %p2487_p2, %p2486_p1 }
 0x685   :  { %p2489_p4 = pnand %p2488_p3, %p2482_p0 }
 0x711   :  { %v2092_v47 = vpop.f32.mrb[32].mxu0 }
 0x712   :  { %v1443_v21 = vmul.f32 %v2465_v20, %v2092_v47  ;;  %v1363_v50 = vpop.f32.mrb[33].mxu0  ;;  %v1729_v20 = vld [vmem:[%s3243_s11] ss:$0 sm:$0xff] }
 0x713   :  { %v1442_v26 = vmul.f32 %v2466_v1, %v1363_v50 }
 0x715   :  { %v2276_v27 = vpack.c.bf16 %v1443_v21, %v1442_v26  ;;  %v2095_v12 = vpop.f32.mrb[34].mxu0 }
 0x716   :  { %v1445_v22 = vmul.f32 %v2467_v13, %v2095_v12  ;;  %v1373_v29 = vpop.f32.mrb[35].mxu0 }
 0x717   :  { %v1444_v31 = vmul.f32 %v2468_v30, %v1373_v29  ;;  %2277 = vmatprep.subr.bf16.mxu1 %v2276_v27 }
 0x718   :  { %2279 = vmatpush3.bf16.msra.mxu1 %v2276_v27 }
 0x719   :  { %v2280_v25 = vpack.c.bf16 %v1445_v22, %v1444_v31  ;;  %v2098_v37 = vpop.f32.mrb[36].mxu0 }
 0x71a   :  { %v1447_v56 = vmul.f32 %v2469_v46, %v2098_v37  ;;  %v1383_v23 = vpop.f32.mrb[37].mxu0 }
 0x71b   :  { %v1446_v33 = vmul.f32 %v2470_v24, %v1383_v23  ;;  %2281 = vmatprep.subr.bf16.mxu1 %v2280_v25 }
 0x71c   :  { %2283 = vmatpush3.bf16.msra.mxu1 %v2280_v25 }
 0x71d   :  { %v2284_v58 = vpack.c.bf16 %v1447_v56, %v1446_v33 }
 0x71e   :  { %v2101_v40 = vpop.f32.mrb[38].mxu0 }
 0x71f   :  { %v1449_v34 = vmul.f32 %v2471_v60, %v2101_v40  ;;  %2285 = vmatprep.subr.bf16.mxu1 %v2284_v58  ;;  %v1393_v28 = vpop.f32.mrb[39].mxu0 }
 0x720   :  { %v1448_v35 = vmul.f32 %v2472_v63, %v1393_v28  ;;  %2287 = vmatpush3.bf16.msra.mxu1 %v2284_v58 }
 0x722   :  { %v2288_v43 = vpack.c.bf16 %v1449_v34, %v1448_v35 }
 0x724   :  { %2289 = vmatprep.subr.bf16.mxu1 %v2288_v43 }
 0x725   :  { %2291 = vmatpush3.bf16.msra.mxu1 %v2288_v43 }
 0x747   :  { %v2104_v36 = vpop.f32.mrb[40].mxu0 }
 0x748   :  { %v1451_v38 = vmul.f32 %v2473_v57, %v2104_v36  ;;  %v1403_v62 = vpop.f32.mrb[41].mxu0 }
 0x749   :  { %v1450_v39 = vmul.f32 %v2474_v32, %v1403_v62 }
 0x74b   :  { %v2292_v41 = vpack.c.bf16 %v1451_v38, %v1450_v39  ;;  %v2107_v42 = vpop.f32.mrb[42].mxu0 }
 0x74c   :  { %v1453_v48 = vmul.f32 %v2475_v45, %v2107_v42  ;;  %v1413_v51 = vpop.f32.mrb[43].mxu0 }
 0x74d   :  { %v1452_v54 = vmul.f32 %v2476_v53, %v1413_v51  ;;  %2293 = vmatprep.subr.bf16.mxu1 %v2292_v41 }
 0x74e   :  { %2295 = vmatpush3.bf16.msra.mxu1 %v2292_v41 }
 0x74f   :  { %v2296_v59 = vpack.c.bf16 %v1453_v48, %v1452_v54  ;;  %v2110_v0 = vpop.f32.mrb[44].mxu0 }
 0x750   :  { %v1455_v3 = vmul.f32 %v2477_v4, %v2110_v0  ;;  %v1423_v6 = vpop.f32.mrb[45].mxu0 }
 0x751   :  { %v1454_v5 = vmul.f32 %v2478_v55, %v1423_v6  ;;  %2297 = vmatprep.subr.bf16.mxu1 %v2296_v59 }
 0x752   :  { %2299 = vmatpush3.bf16.msra.mxu1 %v2296_v59 }
 0x753   :  { %v2300_v9 = vpack.c.bf16 %v1455_v3, %v1454_v5  ;;  %v2113_v10 = vpop.f32.mrb[46].mxu0 }
 0x754   :  { %v1457_v8 = vmul.f32 %v2479_v7, %v2113_v10  ;;  %v1433_v11 = vpop.f32.mrb[47].mxu0 }
 0x755   :  { %v1456_v17 = vmul.f32 %v2480_v16, %v1433_v11  ;;  %2301 = vmatprep.subr.bf16.mxu1 %v2300_v9 }
 0x756   :  { %2303 = vmatpush3.bf16.msra.mxu1 %v2300_v9 }
 0x757   :  { %v2304_v18 = vpack.c.bf16 %v1457_v8, %v1456_v17 }
 0x759   :  { %2305 = vmatprep.subr.bf16.mxu1 %v2304_v18 }
 0x75a   :  { %2307 = vmatpush3.bf16.msra.mxu1 %v2304_v18 }
 0x75b   :  { %2309 = vmatprep.subr.bf16.mxu1 %v2308_v61 }
 0x75d   :  { %2147 = vmatmul.mubr.f32.vlgmr.msra.gmra.mrb[34].mxu1 %v1459_v2 }
 0x75e   :  { %2311 = vmatpush3.bf16.msra.mxu1 %v2308_v61 }
 0x75f   :  { %2313 = vmatprep.subr.bf16.mxu1 %v2312_v52 }
 0x762   :  { %2315 = vmatpush3.bf16.msra.mxu1 %v2312_v52 }
 0x830   :  { %v2148_v19 = vpop.f32.mrb[34].mxu1 }
 0x831   :  { %v1526_v47 = vpop.f32.mrb[35].mxu1 }
 0x832   :  { %2157 = vmatprep.mubr.msk.f32.mxu1 %vm55_vm0, %v1526_v47 }
 0x833   :  { %2158 = vmatmul.mubr.msk.f32.vlgmr.msra.gmra.mrb[36].mxu1 %vm55_vm0, %v2148_v19 }
 0x906   :  { %v2159_v21 = vpop.f32.mrb[36].mxu1 }
 0x907   :  { %v1624_v50 = vadd.f32 %v2159_v21, %v1729_v20  ;;  %v1618_v1 = vpop.f32.mrb[37].mxu1 }
 0x908   :  { %v1619_v26 = vadd.f32 %v1729_v20, %v1618_v1 }
 0x909   :  { %1628 = vst.msk [vmem:[#allocation2 + $0x8] sm:$0xff] %vm55_vm0, %v1624_v50 }
 0x90a   :  { %1627 = vst.msk [vmem:[#allocation2] sm:$0xff] %vm55_vm0, %v1619_v26 }
 0x90b   :  { %2492 = shalt.err (!%p2489_p4)
}
 0x90c   :  { %s2493_s15 = scalar_lea.hbm %s3244_s12, 256 }
 0x90d   :  { %p2494_p5 = scmp.ne.s32.totalorder %s3244_s12, %s2493_s15  ;;  %p2497_p6 = scmp.lt.u32.totalorder %s2493_s15, %s3244_s12 }
 0x90f   :  { %p2499_p7 = pnand %p2497_p6, %p2494_p5 }
 0x911   :  { %2502 = shalt.err (!%p2499_p7)
}
 0x912   :  { %s2508_s8 = smov 128   ;;  %s2509_s3 = smov 8  }
 0x913   :  { %1640 = dma.vmem_to_hbm [thread:$0]  %s1635_s14, 256, %s3244_s12, [#allocation3], %s2508_s8, %s2508_s8, %s2509_s3  }
 0x914   :  { %2503 = dma.done.wait [#allocation3], 256  }
 0x915   :  { %2504 = vsyncadd [#allocation3], 4294967040 }
 0x916   :  { %1644 = vsyncpa [#allocation3], 1 }

</bundles_post_ra>
